<compile_context>
chip_gen: v7x
topology: tpu7x:2x2x1
jax: 0.10.0
libtpu: 0.0.40
codegen_flags: <defaults>
</compile_context>

<pallas_src>
import jax
import jax.numpy as jnp
from jax.experimental import pallas as pl
from jax.experimental.pallas import tpu as pltpu


def _round_up(x, m):
    return ((x + m - 1) // m) * m


def critic_kernel(s_ref, a_ref, w1s_ref, w1a_ref, b1_ref, w2_ref, b2_ref,
                  wq_ref, bq_ref, q_ref):
    # fc1: split-weight form of relu(concat(state, action) @ W1 + b1).
    h1 = jnp.dot(s_ref[...], w1s_ref[...], preferred_element_type=jnp.float32)
    h1 = h1 + jnp.dot(a_ref[...], w1a_ref[...], preferred_element_type=jnp.float32)
    h1 = jnp.maximum(h1 + b1_ref[...], 0.0)

    # fc2
    h2 = jnp.dot(h1, w2_ref[...], preferred_element_type=jnp.float32) + b2_ref[...]
    h2 = jnp.maximum(h2, 0.0)

    # q head: 256 -> 1 done on VPU (elementwise mul) + XLU lane reduction,
    # avoiding an N=1 MXU matmul.
    q = jnp.sum(h2 * wq_ref[...], axis=-1, keepdims=True) + bq_ref[...]
    q_ref[...] = q.astype(q_ref.dtype)


def critic_forward(state, action, params, *, tb=None):
    """state: (B, input_dim) f32, action: (B, n_actions) f32 -> (B, 1) f32."""
    w1s, w1a, b1, w2, b2, wq, bq = params
    B, input_dim = state.shape
    n_actions = action.shape[1]

    # Batch tile: multiple of 8 sublanes, capped at 128 (fills the MXU rows
    # when the batch is large, e.g. replay minibatches at training time).
    if tb is None:
        tb = min(128, _round_up(B, 8))
    b_pad = _round_up(B, tb)
    if b_pad != B:
        pad = b_pad - B
        state = jnp.pad(state, ((0, pad), (0, 0)))
        action = jnp.pad(action, ((0, pad), (0, 0)))

    grid = (b_pad // tb,)

    def batch_spec(feat):
        return pl.BlockSpec((tb, feat), lambda i: (i, 0))

    def resident_spec(arr):
        # Full array, same block every grid step -> stays resident in VMEM.
        return pl.BlockSpec(arr.shape, lambda i: (0, 0))

    q = pl.pallas_call(
        critic_kernel,
        out_shape=jax.ShapeDtypeStruct((b_pad, 1), jnp.float32),
        grid=grid,
        in_specs=[
            batch_spec(input_dim),       # state tile
            batch_spec(n_actions),       # action tile
            resident_spec(w1s),
            resident_spec(w1a),
            resident_spec(b1),
            resident_spec(w2),
            resident_spec(b2),
            resident_spec(wq),
            resident_spec(bq),
        ],
        out_specs=pl.BlockSpec((tb, 1), lambda i: (i, 0)),
        compiler_params=pltpu.CompilerParams(
            dimension_semantics=("parallel",)),
    )(state, action, w1s, w1a, b1, w2, b2, wq, bq)

    return q[:B]


def init_params(key, input_dim, n_actions, fc1_dims, fc2_dims):
    """Mimics PyTorch nn.Linear default init (uniform +-1/sqrt(fan_in)).

    W1 is sampled at full size (d_in, fc1) then split row-wise into the
    state part and action part, so the split-weight kernel is exactly the
    concat formulation. Biases are (1, out) for clean sublane broadcast.
    """
    def linear(key, fan_in, fan_out):
        kw, kb = jax.random.split(key)
        bound = 1.0 / jnp.sqrt(jnp.float32(fan_in))
        w = jax.random.uniform(kw, (fan_in, fan_out), jnp.float32, -bound, bound)
        b = jax.random.uniform(kb, (1, fan_out), jnp.float32, -bound, bound)
        return w, b

    k1, k2, k3 = jax.random.split(key, 3)
    d_in = input_dim + n_actions
    w1, b1 = linear(k1, d_in, fc1_dims)
    w1s, w1a = w1[:input_dim], w1[input_dim:]
    w2, b2 = linear(k2, fc1_dims, fc2_dims)
    wq_t, bq = linear(k3, fc2_dims, 1)        # (fc2, 1), (1, 1)
    wq = wq_t.reshape(1, fc2_dims)            # q-head row, lane-dense (1, fc2)
    # TODO(synk): on v6e/v7x, store w1s/w1a/w2 in bfloat16 (keep f32 accumulation)
    # to halve weight DMA; kept f32 here so one script is exact on v5e too.
    return (w1s, w1a, b1, w2, b2, wq, bq)


if __name__ == "__main__":
    # Small, module-consistent shapes.
    batch = 8
    input_dims = (16,)          # state dimension
    n_actions = 4
    fc1_dims = 256              # module defaults
    fc2_dims = 256

    key = jax.random.PRNGKey(0)
    k_params, k_state, k_action = jax.random.split(key, 3)

    params = init_params(k_params, input_dims[0], n_actions, fc1_dims, fc2_dims)
    state = jax.random.normal(k_state, (batch, input_dims[0]), jnp.float32)
    action = jax.random.normal(k_action, (batch, n_actions), jnp.float32)

    q = critic_forward(state, action, params)
    q = jax.block_until_ready(q)

    # Reference check (pure JAX, concat formulation of the same math).
    w1s, w1a, b1, w2, b2, wq, bq = params
    w1_full = jnp.concatenate([w1s, w1a], axis=0)
    x = jnp.concatenate([state, action], axis=1)
    h1 = jnp.maximum(x @ w1_full + b1, 0.0)
    h2 = jnp.maximum(h1 @ w2 + b2, 0.0)
    q_ref = h2 @ wq.T + bq

    assert q.shape == (batch, 1)
    assert jnp.allclose(q, q_ref, atol=1e-4, rtol=1e-4)

    print("KERNEL_OK")
</pallas_src>

<mosaic_0001>
module attributes {stable_mosaic.version = 11 : i64} {
  func.func @critic_kernel(%arg0: i32, %arg1: memref<8x16xf32, #tpu.memory_space<vmem>>, %arg2: memref<8x4xf32, #tpu.memory_space<vmem>>, %arg3: memref<16x256xf32, #tpu.memory_space<vmem>>, %arg4: memref<4x256xf32, #tpu.memory_space<vmem>>, %arg5: memref<1x256xf32, #tpu.memory_space<vmem>>, %arg6: memref<256x256xf32, #tpu.memory_space<vmem>>, %arg7: memref<1x256xf32, #tpu.memory_space<vmem>>, %arg8: memref<1x256xf32, #tpu.memory_space<vmem>>, %arg9: memref<1x1xf32, #tpu.memory_space<vmem>>, %arg10: memref<8x1xf32, #tpu.memory_space<vmem>>) attributes {dimension_semantics = [#tpu.dimension_semantics<parallel>], iteration_bounds = array<i64: 1>, scalar_prefetch = 0 : i64, scratch_operands = 0 : i64, tpu.core_type = #tpu.core_type<tc>, window_params = [{transform_indices = @transform_0, window_bounds = array<i64: 8, 16>}, {transform_indices = @transform_1, window_bounds = array<i64: 8, 4>}, {pipeline_mode = #tpu.pipeline_mode<synchronous>, transform_indices = @transform_2, window_bounds = array<i64: 16, 256>}, {pipeline_mode = #tpu.pipeline_mode<synchronous>, transform_indices = @transform_3, window_bounds = array<i64: 4, 256>}, {pipeline_mode = #tpu.pipeline_mode<synchronous>, transform_indices = @transform_4, window_bounds = array<i64: 1, 256>}, {pipeline_mode = #tpu.pipeline_mode<synchronous>, transform_indices = @transform_5, window_bounds = array<i64: 256, 256>}, {pipeline_mode = #tpu.pipeline_mode<synchronous>, transform_indices = @transform_6, window_bounds = array<i64: 1, 256>}, {pipeline_mode = #tpu.pipeline_mode<synchronous>, transform_indices = @transform_7, window_bounds = array<i64: 1, 256>}, {pipeline_mode = #tpu.pipeline_mode<synchronous>, transform_indices = @transform_8, window_bounds = array<i64: 1, 1>}, {transform_indices = @transform_9, window_bounds = array<i64: 8, 1>}]} {
    %c0 = arith.constant 0 : index
    %c0_0 = arith.constant 0 : index
    %0 = vector.load %arg1[%c0, %c0_0] : memref<8x16xf32, #tpu.memory_space<vmem>>, vector<8x16xf32>
    %c0_1 = arith.constant 0 : index
    %c0_2 = arith.constant 0 : index
    %1 = vector.load %arg3[%c0_1, %c0_2] : memref<16x256xf32, #tpu.memory_space<vmem>>, vector<16x256xf32>
    %cst = arith.constant dense<0.000000e+00> : vector<8x256xf32>
    %2 = tpu.matmul %0, %1, %cst {dimension_numbers = #tpu.dot_dimension_numbers<[1], [0], [0], [1], [0, 0, 1, 1], [], []>} : vector<8x16xf32>, vector<16x256xf32>, vector<8x256xf32> -> vector<8x256xf32>
    %c0_3 = arith.constant 0 : index
    %c0_4 = arith.constant 0 : index
    %3 = vector.load %arg2[%c0_3, %c0_4] : memref<8x4xf32, #tpu.memory_space<vmem>>, vector<8x4xf32>
    %c0_5 = arith.constant 0 : index
    %c0_6 = arith.constant 0 : index
    %4 = vector.load %arg4[%c0_5, %c0_6] : memref<4x256xf32, #tpu.memory_space<vmem>>, vector<4x256xf32>
    %cst_7 = arith.constant dense<0.000000e+00> : vector<8x256xf32>
    %5 = tpu.matmul %3, %4, %cst_7 {dimension_numbers = #tpu.dot_dimension_numbers<[1], [0], [0], [1], [0, 0, 1, 1], [], []>} : vector<8x4xf32>, vector<4x256xf32>, vector<8x256xf32> -> vector<8x256xf32>
    %6 = arith.addf %2, %5 : vector<8x256xf32>
    %c0_8 = arith.constant 0 : index
    %c0_9 = arith.constant 0 : index
    %7 = vector.load %arg5[%c0_8, %c0_9] : memref<1x256xf32, #tpu.memory_space<vmem>>, vector<1x256xf32>
    %8 = vector.broadcast %7 : vector<1x256xf32> to vector<8x256xf32>
    %9 = arith.addf %6, %8 : vector<8x256xf32>
    %cst_10 = arith.constant 0.000000e+00 : f32
    %10 = vector.broadcast %cst_10 : f32 to vector<8x256xf32>
    %11 = arith.maximumf %9, %10 : vector<8x256xf32>
    %c0_11 = arith.constant 0 : index
    %c0_12 = arith.constant 0 : index
    %12 = vector.load %arg6[%c0_11, %c0_12] : memref<256x256xf32, #tpu.memory_space<vmem>>, vector<256x256xf32>
    %cst_13 = arith.constant dense<0.000000e+00> : vector<8x256xf32>
    %13 = tpu.matmul %11, %12, %cst_13 {dimension_numbers = #tpu.dot_dimension_numbers<[1], [0], [0], [1], [0, 0, 1, 1], [], []>} : vector<8x256xf32>, vector<256x256xf32>, vector<8x256xf32> -> vector<8x256xf32>
    %c0_14 = arith.constant 0 : index
    %c0_15 = arith.constant 0 : index
    %14 = vector.load %arg7[%c0_14, %c0_15] : memref<1x256xf32, #tpu.memory_space<vmem>>, vector<1x256xf32>
    %15 = vector.broadcast %14 : vector<1x256xf32> to vector<8x256xf32>
    %16 = arith.addf %13, %15 : vector<8x256xf32>
    %cst_16 = arith.constant 0.000000e+00 : f32
    %17 = vector.broadcast %cst_16 : f32 to vector<8x256xf32>
    %18 = arith.maximumf %16, %17 : vector<8x256xf32>
    %c0_17 = arith.constant 0 : index
    %c0_18 = arith.constant 0 : index
    %19 = vector.load %arg8[%c0_17, %c0_18] : memref<1x256xf32, #tpu.memory_space<vmem>>, vector<1x256xf32>
    %20 = vector.broadcast %19 : vector<1x256xf32> to vector<8x256xf32>
    %21 = arith.mulf %18, %20 : vector<8x256xf32>
    %cst_19 = arith.constant dense<0.000000e+00> : vector<8xf32>
    %22 = vector.multi_reduction <add>, %21, %cst_19 [1] : vector<8x256xf32> to vector<8xf32>
    %23 = vector.shape_cast %22 : vector<8xf32> to vector<8x1xf32>
    %c0_20 = arith.constant 0 : index
    %c0_21 = arith.constant 0 : index
    %24 = vector.load %arg9[%c0_20, %c0_21] : memref<1x1xf32, #tpu.memory_space<vmem>>, vector<1x1xf32>
    %25 = vector.broadcast %24 : vector<1x1xf32> to vector<8x1xf32>
    %26 = arith.addf %23, %25 : vector<8x1xf32>
    %c0_22 = arith.constant 0 : index
    %c0_23 = arith.constant 0 : index
    %27 = vector.load %arg10[%c0_22, %c0_23] : memref<8x1xf32, #tpu.memory_space<vmem>>, vector<8x1xf32>
    tpu.vector_store %arg10[%c0_22, %c0_23], %26 {strides = array<i32>} : memref<8x1xf32, #tpu.memory_space<vmem>>, vector<8x1xf32>,
    return
  }
  func.func @transform_0(%arg0: i32) -> (i32, i32) {
    %c0_i32 = arith.constant 0 : i32
    %c0_i32_0 = arith.constant 0 : i32
    return %arg0, %c0_i32 : i32, i32
  }
  func.func @transform_1(%arg0: i32) -> (i32, i32) {
    %c0_i32 = arith.constant 0 : i32
    %c0_i32_0 = arith.constant 0 : i32
    return %arg0, %c0_i32 : i32, i32
  }
  func.func @transform_2(%arg0: i32) -> (i32, i32) {
    %c0_i32 = arith.constant 0 : i32
    %c0_i32_0 = arith.constant 0 : i32
    %c0_i32_1 = arith.constant 0 : i32
    return %c0_i32, %c0_i32_0 : i32, i32
  }
  func.func @transform_3(%arg0: i32) -> (i32, i32) {
    %c0_i32 = arith.constant 0 : i32
    %c0_i32_0 = arith.constant 0 : i32
    %c0_i32_1 = arith.constant 0 : i32
    return %c0_i32, %c0_i32_0 : i32, i32
  }
  func.func @transform_4(%arg0: i32) -> (i32, i32) {
    %c0_i32 = arith.constant 0 : i32
    %c0_i32_0 = arith.constant 0 : i32
    %c0_i32_1 = arith.constant 0 : i32
    return %c0_i32, %c0_i32_0 : i32, i32
  }
  func.func @transform_5(%arg0: i32) -> (i32, i32) {
    %c0_i32 = arith.constant 0 : i32
    %c0_i32_0 = arith.constant 0 : i32
    %c0_i32_1 = arith.constant 0 : i32
    return %c0_i32, %c0_i32_0 : i32, i32
  }
  func.func @transform_6(%arg0: i32) -> (i32, i32) {
    %c0_i32 = arith.constant 0 : i32
    %c0_i32_0 = arith.constant 0 : i32
    %c0_i32_1 = arith.constant 0 : i32
    return %c0_i32, %c0_i32_0 : i32, i32
  }
  func.func @transform_7(%arg0: i32) -> (i32, i32) {
    %c0_i32 = arith.constant 0 : i32
    %c0_i32_0 = arith.constant 0 : i32
    %c0_i32_1 = arith.constant 0 : i32
    return %c0_i32, %c0_i32_0 : i32, i32
  }
  func.func @transform_8(%arg0: i32) -> (i32, i32) {
    %c0_i32 = arith.constant 0 : i32
    %c0_i32_0 = arith.constant 0 : i32
    %c0_i32_1 = arith.constant 0 : i32
    return %c0_i32, %c0_i32_0 : i32, i32
  }
  func.func @transform_9(%arg0: i32) -> (i32, i32) {
    %c0_i32 = arith.constant 0 : i32
    %c0_i32_0 = arith.constant 0 : i32
    return %arg0, %c0_i32 : i32, i32
  }
}

</mosaic_0001>

<bundles_post_ra>
// kernel: tpu_custom_call.1
= control target key start
LH: loop header
LB: loop body
LE: loop exit
PB: predicated region body
PF: predicated region fallthrough
CT: control target
= control target key end

     0   :  { %s658_s0 = inlined_call_operand.vmem [shape: f32[8,16], index: 0, kind: input, shape index: {}]   ;;  %s659_s1 = inlined_call_operand.vmem [shape: f32[8,4], index: 1, kind: input, shape index: {}]   ;;  %s660_s2 = inlined_call_operand.hbm [shape: f32[16,256], index: 2, kind: input, shape index: {}]   ;;  %s661_s3 = inlined_call_operand.vmem [shape: f32[4,256], index: 3, kind: input, shape index: {}]   ;;  %s662_s4 = inlined_call_operand.vmem [shape: f32[1,256], index: 4, kind: input, shape index: {}]   ;;  %s663_s5 = inlined_call_operand.hbm [shape: f32[256,256], index: 5, kind: input, shape index: {}]   ;;  %s664_s6 = inlined_call_operand.vmem [shape: f32[1,256], index: 6, kind: input, shape index: {}]   ;;  %s665_s7 = inlined_call_operand.vmem [shape: f32[1,256], index: 7, kind: input, shape index: {}]   ;;  %s666_s8 = inlined_call_operand.<no memory space> [shape: f32[1,1], index: 8, kind: input, shape index: {}]   ;;  %s667_s9 = inlined_call_operand.vmem [shape: f32[8,1], index: 9, kind: output, shape index: {}]  }
   0x1   :  { %v14_v0 = vstv %s666_s8 }
   0x2   :  { %15 = vst [vmem:[#allocation2] sm:$0x1] %v14_v0 }
   0x3   :  { %16 = vsyncpa [#allocation4], 0 }
   0x4   :  { %17 = vsyncpa [#allocation6], 0  ;;  %s553_s11 = smov [#allocation3]   ;;  %s505_s15 = scalar_lea.hbm %s660_s2, 512 }
   0x5   :  { %s27_s12 = sshll.u32 %s553_s11, 4  ;;  %p506_p0 = scmp.ne.s32.totalorder %s660_s2, %s505_s15  ;;  %s28_s12 = int_to_ptr.vmem [resolvable:$true] %s27_s12 }
   0x6   :  { %p509_p1 = scmp.lt.u32.totalorder %s505_s15, %s660_s2 }
   0x8   :  { %p511_p2 = pnand %p509_p1, %p506_p0 }
   0xa   :  { %514 = shalt.err (!%p511_p2)
}
   0xb   :  { %s515_s8 = scalar_lea.vmem %s28_s12, 512  ;;  %p520_p4 = scmp.lt.s32.totalorder %s28_s12, %s28_s12 }
   0xc   :  { %p516_p3 = scmp.ne.s32.totalorder %s28_s12, %s515_s8  ;;  %p521_p5 = scmp.lt.s32.totalorder %s515_s8, %s515_s8 }
   0xe   :  { %p522_p6 = por %p521_p5, %p520_p4 }
  0x10   :  { %p523_p7 = pnand %p522_p6, %p516_p3 }
  0x12   :  { %526 = shalt.err (!%p523_p7)
}
  0x13   :  { %s554_s20 = smov 256   ;;  %s555_s21 = smov 16  }
  0x14   :  { %33 = dma.hbm_to_vmem [thread:$0]  %s660_s2, 512, %s28_s12, [#allocation4], %s554_s20, %s554_s20, %s555_s21  }
  0x15   :  { %s556_s24 = smov [#allocation5]   ;;  %s527_s28 = scalar_lea.hbm %s663_s5, 8192 }
  0x16   :  { %s43_s25 = sshll.u32 %s556_s24, 4  ;;  %p528_p8 = scmp.ne.s32.totalorder %s663_s5, %s527_s28  ;;  %s44_s25 = int_to_ptr.vmem [resolvable:$true] %s43_s25 }
  0x17   :  { %p531_p9 = scmp.lt.u32.totalorder %s527_s28, %s663_s5 }
  0x19   :  { %p533_p10 = pnand %p531_p9, %p528_p8 }
  0x1b   :  { %536 = shalt.err (!%p533_p10)
}
  0x1c   :  { %s537_s13 = scalar_lea.vmem %s44_s25, 8192  ;;  %p542_p12 = scmp.lt.s32.totalorder %s44_s25, %s44_s25 }
  0x1d   :  { %p538_p11 = scmp.ne.s32.totalorder %s44_s25, %s537_s13  ;;  %p543_p13 = scmp.lt.s32.totalorder %s537_s13, %s537_s13 }
  0x1f   :  { %p544_p0 = por %p543_p13, %p542_p12 }
  0x21   :  { %p545_p1 = pnand %p544_p0, %p538_p11 }
  0x23   :  { %548 = shalt.err (!%p545_p1)
}
  0x24   :  { %49 = dma.hbm_to_vmem [thread:$0]  %s663_s5, 8192, %s44_s25, [#allocation6], %s554_s20, %s554_s20, %s555_s21  }
  0x25   :  { %549 = dma.done.wait [#allocation4], 512  }
  0x26   :  { %550 = vsyncadd [#allocation4], 4294966784 }
  0x27   :  { %551 = dma.done.wait [#allocation6], 8192  }
  0x28   :  { %552 = vsyncadd [#allocation6], 4294959104  ;;  %v557_v1 = vmov 0.0   ;;  %v68_v2 = vld [vmem:[%s661_s3] sm:$0xff]  ;;  %vm75_vm0 = vcmask 1043456   ;;  %v64_v3 = vld [vmem:[#allocation3 + $0x8] sm:$0xff] }
  0x29   :  { %144 = vmatprep.mubr.f32.mxu0 %v557_v1  ;;  %v70_v4 = vcombine.high %v68_v2, %v68_v2  ;;  %v66_v5 = vld [vmem:[#allocation3 + $0x18] sm:$0xff]  ;;  %v63_v6 = vld [vmem:[#allocation3] sm:$0xff]  ;;  %v65_v7 = vld [vmem:[#allocation3 + $0x10] sm:$0xff]  ;;  %vm71_vm1 = vcmask 31744   ;;  %vm151_vm2 = vcmask 130048   ;;  %vm416_vm3 = vcmask 7168  }
  0x2a   :  { %v67_v8 = vld [vmem:[%s659_s1] sm:$0xff]  ;;  %v429_v9 = vpack.c.bf16 %v66_v5, %v64_v3  ;;  %v431_v10 = vpack.c.bf16 %v65_v7, %v63_v6  ;;  %v243_v11 = vld [vmem:[#allocation5 + $0x8] sm:$0xff]  ;;  %v244_v15 = vld [vmem:[#allocation5 + $0x10] sm:$0xff] }
  0x2b   :  { %v245_v12 = vld [vmem:[#allocation5 + $0x18] sm:$0xff]  ;;  %424 = vmatprep.subr.msk.mxu0 %vm75_vm0, %v70_v4  ;;  %v242_v14 = vld [vmem:[#allocation5] sm:$0xff]  ;;  %v247_v16 = vld [vmem:[#allocation5 + $0x28] sm:$0xff] }
  0x2c   :  { %v433_v13 = vpack.c.bf16 %v245_v12, %v243_v11  ;;  %425 = vmatpush1.msk.msra.mxu0 %vm75_vm0, %v68_v2  ;;  %v435_v17 = vpack.c.bf16 %v244_v15, %v242_v14  ;;  %v249_v18 = vld [vmem:[#allocation5 + $0x38] sm:$0xff]  ;;  %v246_v20 = vld [vmem:[#allocation5 + $0x20] sm:$0xff]  ;;  %v248_v21 = vld [vmem:[#allocation5 + $0x30] sm:$0xff] }
  0x2d   :  { %426 = vmatmul.mubr.msk.f32.vlgmr.msra.gmra.mrb[0].mxu0 %vm71_vm1, %v67_v8  ;;  %430 = vmatprep.subr.bf16.mxu0 %v429_v9  ;;  %v437_v19 = vpack.c.bf16 %v249_v18, %v247_v16  ;;  %v251_v22 = vld [vmem:[#allocation5 + $0x48] sm:$0xff]  ;;  %v253_v23 = vld [vmem:[#allocation5 + $0x58] sm:$0xff]  ;;  %v439_v24 = vpack.c.bf16 %v248_v21, %v246_v20  ;;  %v250_v26 = vld [vmem:[#allocation5 + $0x40] sm:$0xff] }
  0x2e   :  { %432 = vmatpush1.bf16.msra.mxu0 %v431_v10  ;;  %219 = vmatprep.mubr.f32.mxu0 %v557_v1  ;;  %v441_v25 = vpack.c.bf16 %v253_v23, %v251_v22  ;;  %v252_v27 = vld [vmem:[#allocation5 + $0x50] sm:$0xff]  ;;  %v62_v28 = vld [vmem:[%s658_s0] sm:$0xff]  ;;  %v255_v29 = vld [vmem:[#allocation5 + $0x68] sm:$0xff] }
  0x2f   :  { %434 = vmatprep.subr.bf16.mxu1 %v433_v13  ;;  %v257_v30 = vld [vmem:[#allocation5 + $0x78] sm:$0xff]  ;;  %v443_v31 = vpack.c.bf16 %v252_v27, %v250_v26  ;;  %v254_v33 = vld [vmem:[#allocation5 + $0x60] sm:$0xff]  ;;  %v256_v34 = vld [vmem:[#allocation5 + $0x70] sm:$0xff] }
  0x30   :  { %436 = vmatpush1.bf16.msra.mxu1 %v435_v17  ;;  %v445_v32 = vpack.c.bf16 %v257_v30, %v255_v29  ;;  %v259_v35 = vld [vmem:[#allocation5 + $0x88] sm:$0xff]  ;;  %v261_v36 = vld [vmem:[#allocation5 + $0x98] sm:$0xff]  ;;  %v447_v37 = vpack.c.bf16 %v256_v34, %v254_v33  ;;  %v258_v39 = vld [vmem:[#allocation5 + $0x80] sm:$0xff] }
  0x31   :  { %438 = vmatprep.subr.bf16.mxu1 %v437_v19  ;;  %v449_v38 = vpack.c.bf16 %v261_v36, %v259_v35  ;;  %v260_v40 = vld [vmem:[#allocation5 + $0x90] sm:$0xff]  ;;  %v263_v41 = vld [vmem:[#allocation5 + $0xa8] sm:$0xff]  ;;  %v265_v42 = vld [vmem:[#allocation5 + $0xb8] sm:$0xff] }
  0x32   :  { %v451_v43 = vpack.c.bf16 %v260_v40, %v258_v39  ;;  %v453_v44 = vpack.c.bf16 %v265_v42, %v263_v41  ;;  %v262_v45 = vld [vmem:[#allocation5 + $0xa0] sm:$0xff]  ;;  %v264_v46 = vld [vmem:[#allocation5 + $0xb0] sm:$0xff]  ;;  %v267_v47 = vld [vmem:[#allocation5 + $0xc8] sm:$0xff] }
  0x33   :  { %v269_v48 = vld [vmem:[#allocation5 + $0xd8] sm:$0xff]  ;;  %v455_v49 = vpack.c.bf16 %v264_v46, %v262_v45  ;;  %v266_v51 = vld [vmem:[#allocation5 + $0xc0] sm:$0xff]  ;;  %v268_v52 = vld [vmem:[#allocation5 + $0xd0] sm:$0xff] }
  0x34   :  { %440 = vmatpush1.bf16.msra.mxu1 %v439_v24  ;;  %v457_v50 = vpack.c.bf16 %v269_v48, %v267_v47  ;;  %v271_v53 = vld [vmem:[#allocation5 + $0xe8] sm:$0xff]  ;;  %v273_v54 = vld [vmem:[#allocation5 + $0xf8] sm:$0xff]  ;;  %v459_v55 = vpack.c.bf16 %v268_v52, %v266_v51  ;;  %v270_v57 = vld [vmem:[#allocation5 + $0xe0] sm:$0xff] }
  0x35   :  { %427 = vmatmul.mubr.msk.f32.vlgmr.msra.gmra.mrb[0].mxu0 %vm151_vm2, %v62_v28  ;;  %442 = vmatprep.subr.bf16.mxu1 %v441_v25  ;;  %v461_v56 = vpack.c.bf16 %v273_v54, %v271_v53  ;;  %v272_v58 = vld [vmem:[#allocation5 + $0xf0] sm:$0xff]  ;;  %v275_v59 = vld [vmem:[#allocation5 + $0x108] sm:$0xff]  ;;  %v277_v60 = vld [vmem:[#allocation5 + $0x118] sm:$0xff] }
  0x36   :  { %v463_v61 = vpack.c.bf16 %v272_v58, %v270_v57  ;;  %v465_v62 = vpack.c.bf16 %v277_v60, %v275_v59  ;;  %v274_v63 = vld [vmem:[#allocation5 + $0x100] sm:$0xff]  ;;  %v276_v0 = vld [vmem:[#allocation5 + $0x110] sm:$0xff]  ;;  %v279_v1 = vld [vmem:[#allocation5 + $0x128] sm:$0xff] }
  0x37   :  { %v281_v2 = vld [vmem:[#allocation5 + $0x138] sm:$0xff]  ;;  %v467_v3 = vpack.c.bf16 %v276_v0, %v274_v63  ;;  %v278_v5 = vld [vmem:[#allocation5 + $0x120] sm:$0xff]  ;;  %v280_v6 = vld [vmem:[#allocation5 + $0x130] sm:$0xff] }
  0x38   :  { %444 = vmatpush1.bf16.msra.mxu1 %v443_v31  ;;  %v469_v4 = vpack.c.bf16 %v281_v2, %v279_v1  ;;  %v283_v7 = vld [vmem:[#allocation5 + $0x148] sm:$0xff]  ;;  %v285_v8 = vld [vmem:[#allocation5 + $0x158] sm:$0xff]  ;;  %v471_v9 = vpack.c.bf16 %v280_v6, %v278_v5  ;;  %v282_v11 = vld [vmem:[#allocation5 + $0x140] sm:$0xff] }
  0x39   :  { %446 = vmatprep.subr.bf16.mxu1 %v445_v32  ;;  %v473_v10 = vpack.c.bf16 %v285_v8, %v283_v7  ;;  %v284_v12 = vld [vmem:[#allocation5 + $0x150] sm:$0xff]  ;;  %v287_v13 = vld [vmem:[#allocation5 + $0x168] sm:$0xff]  ;;  %v289_v14 = vld [vmem:[#allocation5 + $0x178] sm:$0xff] }
  0x3a   :  { %v475_v15 = vpack.c.bf16 %v284_v12, %v282_v11  ;;  %v477_v16 = vpack.c.bf16 %v289_v14, %v287_v13  ;;  %v286_v17 = vld [vmem:[#allocation5 + $0x160] sm:$0xff]  ;;  %v288_v18 = vld [vmem:[#allocation5 + $0x170] sm:$0xff]  ;;  %v291_v19 = vld [vmem:[#allocation5 + $0x188] sm:$0xff] }
  0x3b   :  { %v293_v20 = vld [vmem:[#allocation5 + $0x198] sm:$0xff]  ;;  %v479_v21 = vpack.c.bf16 %v288_v18, %v286_v17  ;;  %v290_v23 = vld [vmem:[#allocation5 + $0x180] sm:$0xff]  ;;  %v292_v24 = vld [vmem:[#allocation5 + $0x190] sm:$0xff] }
  0x3c   :  { %448 = vmatpush1.bf16.msra.mxu1 %v447_v37  ;;  %v481_v22 = vpack.c.bf16 %v293_v20, %v291_v19  ;;  %v295_v25 = vld [vmem:[#allocation5 + $0x1a8] sm:$0xff]  ;;  %v297_v26 = vld [vmem:[#allocation5 + $0x1b8] sm:$0xff]  ;;  %v483_v27 = vpack.c.bf16 %v292_v24, %v290_v23  ;;  %v294_v29 = vld [vmem:[#allocation5 + $0x1a0] sm:$0xff] }
  0x3d   :  { %450 = vmatprep.subr.bf16.mxu1 %v449_v38  ;;  %v485_v28 = vpack.c.bf16 %v297_v26, %v295_v25  ;;  %v296_v30 = vld [vmem:[#allocation5 + $0x1b0] sm:$0xff]  ;;  %v299_v31 = vld [vmem:[#allocation5 + $0x1c8] sm:$0xff]  ;;  %v301_v32 = vld [vmem:[#allocation5 + $0x1d8] sm:$0xff] }
  0x3e   :  { %v487_v33 = vpack.c.bf16 %v296_v30, %v294_v29  ;;  %v489_v34 = vpack.c.bf16 %v301_v32, %v299_v31  ;;  %v298_v35 = vld [vmem:[#allocation5 + $0x1c0] sm:$0xff]  ;;  %v300_v36 = vld [vmem:[#allocation5 + $0x1d0] sm:$0xff]  ;;  %v303_v38 = vld [vmem:[#allocation5 + $0x1e8] sm:$0xff] }
  0x3f   :  { %v491_v37 = vpack.c.bf16 %v300_v36, %v298_v35  ;;  %v305_v39 = vld [vmem:[#allocation5 + $0x1f8] sm:$0xff]  ;;  %v302_v41 = vld [vmem:[#allocation5 + $0x1e0] sm:$0xff]  ;;  %v304_v42 = vld [vmem:[#allocation5 + $0x1f0] sm:$0xff] }
  0x40   :  { %452 = vmatpush1.bf16.msra.mxu1 %v451_v43  ;;  %v493_v40 = vpack.c.bf16 %v305_v39, %v303_v38  ;;  %v495_v43 = vpack.c.bf16 %v304_v42, %v302_v41  ;;  %v226_v47 = vld [vmem:[%s662_s4] sm:$0x3] }
  0x41   :  { %454 = vmatprep.subr.bf16.mxu1 %v453_v44  ;;  %v228_v44 = vlaneseq  ;;  %v306_v57 = vld [vmem:[%s664_s6] sm:$0x3] }
  0x42   :  { %v391_v60 = vld [vmem:[%s665_s7] sm:$0x3] }
  0x43   :  { %v229_v45 = vshrl.u32 %v228_v44, 7  ;;  %v428_v8 = vld [vmem:[#allocation2] ss:$0 sm:$0xff] }
  0x44   :  { %456 = vmatpush1.bf16.msra.mxu1 %v455_v49 }
  0x45   :  { %458 = vmatprep.subr.bf16.mxu1 %v457_v50  ;;  %v230_v46 = vsub.s32 0, %v229_v45  ;;  %v234_v48 = vsub.s32 1, %v229_v45 }
  0x47   :  { %v231_v49 = vrot.slane %v226_v47, %v230_v46  ;;  %v235_v50 = vrot.slane %v226_v47, %v234_v48  ;;  %v311_v58 = vrot.slane %v306_v57, %v230_v46  ;;  %v315_v59 = vrot.slane %v306_v57, %v234_v48 }
  0x48   :  { %460 = vmatpush1.bf16.msra.mxu1 %v459_v55  ;;  %v396_v0 = vrot.slane %v391_v60, %v230_v46  ;;  %v400_v2 = vrot.slane %v391_v60, %v234_v48 }
  0x49   :  { %462 = vmatprep.subr.bf16.mxu1 %v461_v56 }
  0x4c   :  { %464 = vmatpush1.bf16.msra.mxu1 %v463_v61 }
  0x4d   :  { %466 = vmatprep.subr.bf16.mxu1 %v465_v62 }
  0x50   :  { %468 = vmatpush1.bf16.msra.mxu1 %v467_v3 }
  0x51   :  { %470 = vmatprep.subr.bf16.mxu1 %v469_v4 }
  0x54   :  { %472 = vmatpush1.bf16.msra.mxu1 %v471_v9 }
  0x55   :  { %474 = vmatprep.subr.bf16.mxu1 %v473_v10 }
  0x58   :  { %476 = vmatpush1.bf16.msra.mxu1 %v475_v15 }
  0x59   :  { %478 = vmatprep.subr.bf16.mxu1 %v477_v16 }
  0x5c   :  { %480 = vmatpush1.bf16.msra.mxu1 %v479_v21 }
  0x5d   :  { %482 = vmatprep.subr.bf16.mxu1 %v481_v22 }
  0x60   :  { %484 = vmatpush1.bf16.msra.mxu1 %v483_v27 }
  0x61   :  { %486 = vmatprep.subr.bf16.mxu1 %v485_v28 }
  0x64   :  { %488 = vmatpush1.bf16.msra.mxu1 %v487_v33 }
  0x65   :  { %490 = vmatprep.subr.bf16.mxu1 %v489_v34 }
  0x68   :  { %492 = vmatpush1.bf16.msra.mxu1 %v491_v37 }
  0x69   :  { %494 = vmatprep.subr.bf16.mxu1 %v493_v40 }
  0x6c   :  { %496 = vmatpush1.bf16.msra.mxu1 %v495_v43 }
 0x108   :  { %v221_v51 = vpop.f32.mrb[0].mxu0 }
 0x109   :  { %v238_v52 = vadd.f32 %v231_v49, %v221_v51  ;;  %v223_v53 = vpop.f32.mrb[1].mxu0 }
 0x10a   :  { %v239_v54 = vadd.f32 %v235_v50, %v223_v53 }
 0x10b   :  { %v240_v56 = vmax.f32 %v238_v52, 0.0 }
 0x10c   :  { %v241_v55 = vmax.f32 %v239_v54, 0.0 }
 0x10e   :  { %382 = vmatprep.mubr.f32.mxu1 %v241_v55 }
 0x10f   :  { %383 = vmatmul.mubr.f32.vlgmr.msra.gmra.mrb[0].mxu1 %v240_v56 }
 0x1e2   :  { %v384_v61 = vpop.f32.mrb[0].mxu1 }
 0x1e3   :  { %v385_v62 = vadd.f32 %v384_v61, %v311_v58  ;;  %v386_v63 = vpop.f32.mrb[1].mxu1 }
 0x1e4   :  { %v387_v1 = vadd.f32 %v386_v63, %v315_v59 }
 0x1e5   :  { %v389_v3 = vmax.f32 %v385_v62, 0.0 }
 0x1e6   :  { %v390_v4 = vmax.f32 %v387_v1, 0.0 }
 0x1e7   :  { %v403_v5 = vmul.f32 %v396_v0, %v389_v3 }
 0x1e8   :  { %v404_v6 = vmul.f32 %v400_v2, %v390_v4 }
 0x1ea   :  { %v405_v7 = vadd.f32 %v404_v6, %v403_v5 }
 0x1ec   :  { %406 = vadd.xlane.f32.xlu0 %v405_v7 }
 0x279   :  { %v407_v9 = vpop.xlane.xlu0 %406 }
 0x27a   :  { %v415_v10 = vadd.f32 %v428_v8, %v407_v9 }
 0x27c   :  { %417 = vst.msk [vmem:[%s667_s9] sm:$0xff] %vm416_vm3, %v415_v10 }
 0x27d   :  { %422 = vsyncpa [#allocation4], 1 }
 0x27e   :  { %423 = vsyncpa [#allocation6], 1 }

</bundles_post_ra>
